<compile_context>
chip_gen: v7x
topology: tpu7x:2x2x1
jax: 0.10.0
libtpu: 0.0.40
codegen_flags: <defaults>
</compile_context>

<pallas_src>
import functools
import math

import jax
import jax.numpy as jnp
from jax.experimental import pallas as pl
from jax.experimental.pallas import tpu as pltpu


# ----------------------------------------------------------------------------
# Stage 1: fused QKV projection  (computed once; no per-query-block recompute)
# ----------------------------------------------------------------------------
def qkv_proj_kernel(x_ref, w_ref, out_ref):
    """x_ref: (TR, D) rows of X.  w_ref: (D, 3D) fused [Wq|Wk|Wv] (head-major
    columns, 1/sqrt(d_model) folded into Wq).  out_ref: (TR, 3D)."""
    out_ref[...] = jnp.dot(
        x_ref[...], w_ref[...], preferred_element_type=jnp.float32
    ).astype(out_ref.dtype)


# ----------------------------------------------------------------------------
# Stage 2: flash-style attention + fused output projection
# ----------------------------------------------------------------------------
def mha_attn_kernel(q_ref, k_ref, v_ref, wo_t_ref, bo_ref, out_ref,
                    m_sc, l_sc, acc_sc, cat_sc, *, num_heads, d_head):
    """One (query block, kv block) grid step.

    q_ref   : (H, TQ, Dh)   query block, head-major, scale already folded in
    k_ref   : (H, TK, Dh)   key block, head-major
    v_ref   : (H, TK, Dh)   value block, head-major
    wo_t_ref: (D, D)        Wo^T  (out = ctx_cat @ Wo^T + bo)
    bo_ref  : (1, D)        output bias (f32)
    out_ref : (TQ, D)       output block (written on the last kv step)
    m_sc/l_sc : (H, TQ, 1)  online-softmax running max / denominator (f32)
    acc_sc  : (H, TQ, Dh)   running weighted-value accumulator (f32)
    cat_sc  : (TQ, D)       head-concatenated context staging tile
    """
    H, Dh = num_heads, d_head
    ki = pl.program_id(1)

    @pl.when(ki == 0)
    def _():
        m_sc[...] = jnp.full_like(m_sc, -jnp.inf)
        l_sc[...] = jnp.zeros_like(l_sc)
        acc_sc[...] = jnp.zeros_like(acc_sc)

    # --- scores for this kv block, batched over heads: (H, TQ, TK), f32 -----
    s = jnp.einsum('hqd,hkd->hqk', q_ref[...], k_ref[...],
                   preferred_element_type=jnp.float32)

    # --- online (flash) softmax update, kept in f32 --------------------------
    m_prev = m_sc[...]
    m_new = jnp.maximum(m_prev, jnp.max(s, axis=-1, keepdims=True))   # (H,TQ,1)
    alpha = jnp.exp(m_prev - m_new)
    p = jnp.exp(s - m_new)                                            # (H,TQ,TK)
    l_sc[...] = alpha * l_sc[...] + jnp.sum(p, axis=-1, keepdims=True)
    acc_sc[...] = alpha * acc_sc[...] + jnp.einsum(
        'hqk,hkd->hqd', p.astype(v_ref.dtype), v_ref[...],
        preferred_element_type=jnp.float32)
    m_sc[...] = m_new

    # attention-weight dropout and output dropout: identity in eval mode

    @pl.when(ki == pl.num_programs(1) - 1)
    def _():
        # Head-concat via static lane-slice stores (no transpose / reshape of
        # the lane dim), then ONE (TQ, D) x (D, D) matmul for the projection.
        for h in range(H):                                   # static unroll
            inv = pl.reciprocal(l_sc[h], approx=True)        # (TQ, 1), EUP vrcp
            cat_sc[:, h * Dh:(h + 1) * Dh] = (acc_sc[h] * inv).astype(cat_sc.dtype)
        out = jnp.dot(cat_sc[...], wo_t_ref[...],
                      preferred_element_type=jnp.float32) + bo_ref[...]
        out_ref[...] = out.astype(out_ref.dtype)


# ----------------------------------------------------------------------------
# Helpers
# ----------------------------------------------------------------------------
def _pick_block(dim, pref):
    """Largest block <= pref that divides `dim` and is a multiple of 8
    (TPU second-minor constraint), falling back to the full dim."""
    if dim <= pref:
        return dim
    for b in range(pref, 0, -1):
        if dim % b == 0 and b % 8 == 0:
            return b
    return dim


def _default_vmem_limit_bytes():
    """Explicit scoped-VMEM budget: ~3/4 of physical per core (review item)."""
    try:
        cap = pltpu.get_tpu_info().vmem_capacity_bytes
        return int(cap) * 3 // 4
    except Exception:
        return 48 * 1024 * 1024   # conservative: fits under v7x's 64 MiB/core


# ----------------------------------------------------------------------------
# Wrapper
# ----------------------------------------------------------------------------
def multi_head_attention(x, wq, wk, wv, wo, bo, *, num_heads,
                         block_q=256, block_kv=256, block_rows=256,
                         matmul_dtype=jnp.bfloat16, out_dtype=None,
                         vmem_limit_bytes=None):
    """x: (S, D) f32.  wq/wk/wv: (H, D, Dh) with y_h = x @ w[h] (pre-transposed
    nn.Linear weights).  wo: (D, D) torch layout (out = c @ wo.T + bo).  bo: (D,).

    matmul_dtype: MXU operand dtype (bf16 is the fast path on v5e/v6e/v7x);
    accumulation and softmax always stay in f32."""
    S, D = x.shape
    H = num_heads
    Dh = D // H
    assert H * Dh == D, "d_model must be divisible by num_heads"

    mm = matmul_dtype
    out_dtype = out_dtype if out_dtype is not None else x.dtype
    vmem_limit = vmem_limit_bytes or _default_vmem_limit_bytes()

    # ---- host-side weight preparation (free; done once at trace time) ------
    scale = 1.0 / math.sqrt(float(D))                 # module uses 1/sqrt(d_model)
    wq_f = jnp.transpose(wq, (1, 0, 2)).reshape(D, D) * scale    # head-major cols
    wk_f = jnp.transpose(wk, (1, 0, 2)).reshape(D, D)
    wv_f = jnp.transpose(wv, (1, 0, 2)).reshape(D, D)
    w_qkv = jnp.concatenate([wq_f, wk_f, wv_f], axis=1).astype(mm)    # (D, 3D)
    wo_t = wo.T.astype(mm)                                            # (D, D)
    bo2 = bo.reshape(1, D).astype(jnp.float32)
    x_mm = x.astype(mm)

    # ---- stage 1: QKV projection, computed once over all rows of X ---------
    tr = _pick_block(S, block_rows)
    qkv = pl.pallas_call(
        qkv_proj_kernel,
        out_shape=jax.ShapeDtypeStruct((S, 3 * D), mm),
        grid=(S // tr,),
        in_specs=[
            pl.BlockSpec((tr, D), lambda i: (i, 0)),
            pl.BlockSpec((D, 3 * D), lambda i: (0, 0)),
        ],
        out_specs=pl.BlockSpec((tr, 3 * D), lambda i: (i, 0)),
        compiler_params=pltpu.CompilerParams(
            dimension_semantics=("parallel",),
            vmem_limit_bytes=vmem_limit),
    )(x_mm, w_qkv)

    # Head-major (H, S, Dh) layout for Q/K/V: one-time HBM relayout in XLA
    # (layout plumbing outside the kernel, not per-grid-step work).
    def to_heads(a):
        return jnp.transpose(a.reshape(S, H, Dh), (1, 0, 2))

    q = to_heads(qkv[:, :D])
    k = to_heads(qkv[:, D:2 * D])
    v = to_heads(qkv[:, 2 * D:])

    # ---- stage 2: flash attention + fused output projection ----------------
    tq = _pick_block(S, block_q)
    tk = _pick_block(S, block_kv)
    grid = (S // tq, S // tk)

    kernel = functools.partial(mha_attn_kernel, num_heads=H, d_head=Dh)
    return pl.pallas_call(
        kernel,
        out_shape=jax.ShapeDtypeStruct((S, D), out_dtype),
        grid=grid,
        in_specs=[
            pl.BlockSpec((H, tq, Dh), lambda qi, ki: (0, qi, 0)),   # Q block
            pl.BlockSpec((H, tk, Dh), lambda qi, ki: (0, ki, 0)),   # K block
            pl.BlockSpec((H, tk, Dh), lambda qi, ki: (0, ki, 0)),   # V block
            pl.BlockSpec((D, D), lambda qi, ki: (0, 0)),            # Wo^T
            pl.BlockSpec((1, D), lambda qi, ki: (0, 0)),            # bias
        ],
        out_specs=pl.BlockSpec((tq, D), lambda qi, ki: (qi, 0)),
        scratch_shapes=[
            pltpu.VMEM((H, tq, 1), jnp.float32),    # m (running max)
            pltpu.VMEM((H, tq, 1), jnp.float32),    # l (running denom)
            pltpu.VMEM((H, tq, Dh), jnp.float32),   # acc (running context)
            pltpu.VMEM((tq, D), mm),                # head-concat staging
        ],
        compiler_params=pltpu.CompilerParams(
            dimension_semantics=("parallel", "arbitrary"),
            vmem_limit_bytes=vmem_limit),
    )(q, k, v, wo_t, bo2)


# ----------------------------------------------------------------------------
# Pure-JAX reference (mirrors the PyTorch forward, eval mode)
# ----------------------------------------------------------------------------
def reference_mha(x, wq, wk, wv, wo, bo, *, num_heads):
    S, D = x.shape
    outs = []
    for h in range(num_heads):
        q = x @ wq[h]
        k = x @ wk[h]
        v = x @ wv[h]
        a = (q @ k.T) / jnp.sqrt(jnp.float32(D))
        a = jax.nn.softmax(a, axis=-1)
        outs.append(a @ v)
    return jnp.concatenate(outs, axis=-1) @ wo.T + bo


if __name__ == "__main__":
    num_heads = 4
    d_model = 32
    seq = 16
    d_head = d_model // num_heads

    key = jax.random.PRNGKey(0)
    kx, kq, kk, kv, kwo, kbo = jax.random.split(key, 6)

    x = jax.random.normal(kx, (seq, d_model), dtype=jnp.float32)

    # Deterministic synthetic parameters (nn.Linear-style bounded uniform).
    def init(k, shape, fan_in):
        bound = 1.0 / math.sqrt(fan_in)
        return jax.random.uniform(k, shape, jnp.float32, -bound, bound)

    # Per-head projection weights, pre-transposed for x @ W[h]
    # (PyTorch nn.Linear(d_model, d_head).weight is (d_head, d_model); we store its T).
    wq = init(kq, (num_heads, d_model, d_head), d_model)
    wk = init(kk, (num_heads, d_model, d_head), d_model)
    wv = init(kv, (num_heads, d_model, d_head), d_model)
    # Output projection in PyTorch (out, in) layout plus bias.
    wo = init(kwo, (d_model, d_model), d_model)
    bo = init(kbo, (d_model,), d_model)

    ref = reference_mha(x, wq, wk, wv, wo, bo, num_heads=num_heads)

    # f32 path, small blocks so both grid axes actually iterate (exercises the
    # online-softmax accumulation and the last-kv-step projection).
    out_f32 = multi_head_attention(x, wq, wk, wv, wo, bo,
                                   num_heads=num_heads,
                                   block_q=8, block_kv=8, block_rows=8,
                                   matmul_dtype=jnp.float32)
    out_f32 = jax.block_until_ready(out_f32)
    assert out_f32.shape == (seq, d_model)
    # tolerance slightly loosened vs exact: softmax uses the EUP approx reciprocal
    assert jnp.allclose(out_f32, ref, atol=5e-3, rtol=1e-3), \
        "f32 kernel mismatch vs reference"

    # bf16 matmul-operand path (default); checked against the f32 kernel output.
    out_bf16 = multi_head_attention(x, wq, wk, wv, wo, bo,
                                    num_heads=num_heads,
                                    matmul_dtype=jnp.bfloat16)
    out_bf16 = jax.block_until_ready(out_bf16)
    max_err = float(jnp.max(jnp.abs(out_bf16.astype(jnp.float32) - out_f32)))
    assert max_err < 1e-1, f"bf16 kernel deviates from f32 kernel: {max_err}"

    print("KERNEL_OK")
</pallas_src>

<mosaic_0001>
module attributes {stable_mosaic.version = 11 : i64} {
  func.func @qkv_proj_kernel(%arg0: i32, %arg1: memref<8x32xf32, #tpu.memory_space<vmem>>, %arg2: memref<32x96xf32, #tpu.memory_space<vmem>>, %arg3: memref<8x96xf32, #tpu.memory_space<vmem>>) attributes {dimension_semantics = [#tpu.dimension_semantics<parallel>], iteration_bounds = array<i64: 2>, scalar_prefetch = 0 : i64, scratch_operands = 0 : i64, tpu.core_type = #tpu.core_type<tc>, window_params = [{transform_indices = @transform_0, window_bounds = array<i64: 8, 32>}, {pipeline_mode = #tpu.pipeline_mode<synchronous>, transform_indices = @transform_1, window_bounds = array<i64: 32, 96>}, {transform_indices = @transform_2, window_bounds = array<i64: 8, 96>}]} {
    %c0 = arith.constant 0 : index
    %c0_0 = arith.constant 0 : index
    %0 = vector.load %arg1[%c0, %c0_0] : memref<8x32xf32, #tpu.memory_space<vmem>>, vector<8x32xf32>
    %c0_1 = arith.constant 0 : index
    %c0_2 = arith.constant 0 : index
    %1 = vector.load %arg2[%c0_1, %c0_2] : memref<32x96xf32, #tpu.memory_space<vmem>>, vector<32x96xf32>
    %cst = arith.constant dense<0.000000e+00> : vector<8x96xf32>
    %2 = tpu.matmul %0, %1, %cst {dimension_numbers = #tpu.dot_dimension_numbers<[1], [0], [0], [1], [0, 0, 1, 1], [], []>} : vector<8x32xf32>, vector<32x96xf32>, vector<8x96xf32> -> vector<8x96xf32>
    %c0_3 = arith.constant 0 : index
    %c0_4 = arith.constant 0 : index
    %3 = vector.load %arg3[%c0_3, %c0_4] : memref<8x96xf32, #tpu.memory_space<vmem>>, vector<8x96xf32>
    tpu.vector_store %arg3[%c0_3, %c0_4], %2 {strides = array<i32>} : memref<8x96xf32, #tpu.memory_space<vmem>>, vector<8x96xf32>,
    return
  }
  func.func @transform_0(%arg0: i32) -> (i32, i32) {
    %c0_i32 = arith.constant 0 : i32
    %c0_i32_0 = arith.constant 0 : i32
    return %arg0, %c0_i32 : i32, i32
  }
  func.func @transform_1(%arg0: i32) -> (i32, i32) {
    %c0_i32 = arith.constant 0 : i32
    %c0_i32_0 = arith.constant 0 : i32
    %c0_i32_1 = arith.constant 0 : i32
    return %c0_i32, %c0_i32_0 : i32, i32
  }
  func.func @transform_2(%arg0: i32) -> (i32, i32) {
    %c0_i32 = arith.constant 0 : i32
    %c0_i32_0 = arith.constant 0 : i32
    return %arg0, %c0_i32 : i32, i32
  }
}

</mosaic_0001>

<bundles_post_ra>
// kernel: tpu_custom_call.1
= control target key start
LH: loop header
LB: loop body
LE: loop exit
PB: predicated region body
PF: predicated region fallthrough
CT: control target
= control target key end

     0   :  { %7 = vsyncpa [#allocation3], 0  ;;  %s797_s0 = inlined_call_operand.hbm [shape: f32[16,32], index: 0, kind: input, shape index: {}]   ;;  %s798_s1 = inlined_call_operand.hbm [shape: f32[32,96], index: 1, kind: input, shape index: {}]   ;;  %s799_s2 = inlined_call_operand.hbm [shape: f32[16,96], index: 2, kind: output, shape index: {}]  }
   0x1   :  { %9 = vsyncpa [#allocation3 + $0x1], 0 }
   0x2   :  { %10 = vsyncpa [#allocation6], 0 }
   0x3   :  { %11 = vsyncpa [#allocation4], 0 }
   0x4   :  { %13 = vsyncpa [#allocation4 + $0x1], 0  ;;  %s601_s9 = smov 0   ;;  %s603_s10 = smov 0  }
   0x5   :  { %s605_s11 = smov 0   ;;  %s607_s12 = smov 0  }
   0x6 LB: > { %s622_s13 = sadd.s32 4294967295, %s576_s12   ;;  %s349_s14 = sadd.s32 4294967294, %s576_s12   ;;  %s576_s12 = sphi %s607_s12, %s819_s12   ;;  %s572_s11 = sphi %s605_s11, %s818_s11   ;;  %s568_s10 = sphi %s603_s10, %s817_s10   ;;  %s564_s9 = sphi %s601_s9, %s816_s9  }
   0x7   : > { %p39_p0 = scmp.ne.s32.totalorder %s568_s10, %s564_s9  ;;  %p800_p1 = scmp.eq.s32.totalorder %s622_s13, 0 }
   0x8   : > { %p90_p3 = scmp.eq.s32.totalorder %s349_s14, 1  ;;  %p350_p5 = scmp.ge.s32.totalorder %s576_s12, 1 }
   0x9   : > { %p631_p4 = por %p800_p1, %p39_p0  ;;  %p97_p7 = scmp.lt.s32.totalorder %s576_s12, 3 }
   0xa   : > { %p636_p6 = por %p90_p3, %p39_p0  ;;  %s578_s18 = smov [#allocation5]  }
   0xb   : > { %s803_s15 = scalar_select %p631_p4, 1, 0 }
   0xc   : > { %s804_s16 = scalar_select %p636_p6, 1, 0 }
   0xd   : > { %p641_p8 = pnand %p350_p5, %p97_p7  ;;  %s109_s19 = sshll.u32 %s578_s18, 4  ;;  %s645_s19 = int_to_ptr.vmem [resolvable:$true] %s109_s19 }
   0xe   : > { %s657_s21 = sadd.s32 1, %s576_s12   ;;  %s26_s22 = sadd.s32 1, %s572_s11 }
   0xf   : > { %s805_s17 = scalar_select %p641_p8, 1, 0 }
  0x10   : > { %p394_p9 = pneg %p641_p8  ;;  %s23_s23 = ssub.s32 %s576_s12, %s657_s21 }
  0x11   : > { %s448_s26 = scalar_lea.hbm %s798_s1, 512 }
  0x12   : > { %p652_p11 = pnand %p394_p9, %p800_p1  ;;  %p449_p12 = scmp.ne.s32.totalorder %s798_s1, %s448_s26 }
  0x13   : > { %p455_p5 = scmp.lt.u32.totalorder %s448_s26, %s798_s1 }
  0x14   : > { %p450_p13 = pneg %p652_p11 }
  0x16   : > { %p451_p0 = pnand %p450_p13, %p449_p12 }
  0x18   : > { %p452_p3 = pneg %p451_p0 }
  0x1a   : > { %p457_p7 = pnand %p455_p5, %p452_p3 }
  0x1c   : > { %460 = shalt.err (!%p457_p7)
}
  0x1d   : > { %s461_s3 = scalar_lea.vmem %s645_s19, 512  ;;  %p469_p2 = scmp.lt.s32.totalorder %s645_s19, %s645_s19 }
  0x1e   : > { %p462_p9 = scmp.ne.s32.totalorder %s645_s19, %s461_s3  ;;  %p470_p6 = scmp.lt.s32.totalorder %s461_s3, %s461_s3 }
  0x20   : > { %p464_p10 = pnand %p462_p9, %p450_p13  ;;  %p471_p4 = por %p470_p6, %p469_p2 }
  0x22   : > { %p465_p1 = pneg %p464_p10 }
  0x24   : > { %p472_p8 = pnand %p471_p4, %p465_p1 }
  0x26   : > { %475 = shalt.err (!%p472_p8)
}
  0x27   : > { %s579_s4 = smov 128   ;;  %s580_s5 = smov 8  }
  0x28   : > { %397 = dma.hbm_to_vmem [thread:$0]  (!%p652_p11), %s798_s1, 512, %s645_s19, [#allocation6], %s579_s4, %s579_s4, %s580_s5  }
  0x29   : > { %p24_p2 = scmp.eq.s32.totalorder %s23_s23, 0  ;;  %p33_p1 = scmp.ne.s32.totalorder %s572_s11, %s568_s10 }
  0x2a   : > { %p34_p4 = scmp.eq.s32.totalorder %s576_s12, 0  ;;  %p407_p6 = scmp.lt.s32.totalorder %s576_s12, 2 }
  0x2b   : > { %s688_s8 = scalar_select %p24_p2, %s572_s11, %s26_s22  }
  0x2c   : > { %p35_p8 = por %p34_p4, %p33_p1  ;;  %p807_p10 = scmp.eq.s32.totalorder %s622_s13, 1 }
  0x2d   : > { %s123_s18 = sand.u32 1, %s572_s11   ;;  %s354_s24 = sshll.u32 %s576_s12, 7 }
  0x2e   : > { %p692_p12 = por %p807_p10, %p33_p1  ;;  %s353_s25 = sshll.u32 %s123_s18, 3 }
  0x2f   : > { %s701_s27 = scalar_lea.hbm %s797_s0, %s354_s24  ;;  %s127_s19 = scalar_lea.vmem [#allocation2], %s353_s25 }
  0x30   : > { %s134_s22 = sshll.u32 %s127_s19, 4  ;;  %p703_p11 = pnand %p407_p6, %p35_p8  ;;  %s707_s22 = int_to_ptr.vmem [resolvable:$true] %s134_s22 }
  0x31   : > { %s124_s28 = scalar_lea.sflag [#allocation3], %s123_s18  ;;  %s476_s29 = scalar_lea.hbm %s701_s27, 128 }
  0x32   : > { %p477_p13 = scmp.ne.s32.totalorder %s701_s27, %s476_s29  ;;  %p478_p0 = pneg %p703_p11 }
  0x33   : > { %s481_s4 = scalar_lea.hbm %s797_s0, 256  ;;  %p482_p7 = scmp.lt.u32.totalorder %s701_s27, %s797_s0 }
  0x34   : > { %p479_p3 = pnand %p478_p0, %p477_p13  ;;  %p483_p9 = scmp.lt.u32.totalorder %s481_s4, %s476_s29 }
  0x35   : > { %p485_p1 = scmp.lt.u32.totalorder %s476_s29, %s701_s27 }
  0x36   : > { %p480_p5 = pneg %p479_p3  ;;  %p484_p2 = por %p483_p9, %p482_p7 }
  0x38   : > { %p486_p4 = por %p485_p1, %p484_p2 }
  0x3a   : > { %p487_p6 = pnand %p486_p4, %p480_p5 }
  0x3c   : > { %490 = shalt.err (!%p487_p6)
}
  0x3d   : > { %s491_s7 = scalar_lea.vmem %s707_s22, 128  ;;  %s581_s18 = smov [#allocation2]  }
  0x3e   : > { %p492_p8 = scmp.ne.s32.totalorder %s707_s22, %s491_s7  ;;  %s496_s24 = sshll.u32 %s581_s18, 4  ;;  %s497_s24 = int_to_ptr.vmem [resolvable:$false] %s496_s24 }
  0x3f   : > { %s498_s25 = scalar_lea.vmem %s497_s24, 256  ;;  %p499_p3 = scmp.lt.s32.totalorder %s707_s22, %s497_s24 }
  0x40   : > { %p494_p10 = pnand %p492_p8, %p478_p0  ;;  %p500_p7 = scmp.lt.s32.totalorder %s498_s25, %s491_s7 }
  0x42   : > { %p495_p13 = pneg %p494_p10  ;;  %p501_p9 = por %p500_p7, %p499_p3 }
  0x44   : > { %p502_p2 = pnand %p501_p9, %p495_p13 }
  0x46   : > { %505 = shalt.err (!%p502_p2)
}
  0x47   : > { %401 = dma.hbm_to_vmem [thread:$0]  (!%p703_p11), %s701_s27, 128, %s707_s22, %s124_s28  }
  0x48   : > { %p810_p5 = scmp.ne.s32.totalorder %s805_s17, 0 }
  0x49   : > { %s737_s20 = sand.u32 (!%p810_p5), 1, %s568_s10   ;;  %p811_p0 = scmp.ne.s32.totalorder (!%p810_p5), %s803_s15, 0 }
  0x4a   : > { %143 = sbr.rel (%p810_p5) target bundleno = 321 (0x141), region = 28  ;;  %s356_s26 = sshll.u32 (!%p810_p5), %s737_s20, 3 }
  0x4b   : > { %s146_s19 = scalar_lea.sflag (!%p810_p5), [#allocation3], %s737_s20  ;;  %s149_s29 = scalar_lea.vmem (!%p810_p5), [#allocation2], %s356_s26 }
  0x51   : > { %551 = dma.done.wait (%p811_p0), %s146_s19, 128  }
  0x52   : > { %553 = vsyncadd (%p811_p0), %s146_s19, 4294967168  ;;  %p812_p1 = scmp.eq.s32.totalorder %s622_s13, 0 }
  0x54   : > { %555 = dma.done.wait (%p812_p1), [#allocation6], 512   ;;  %p813_p11 = pmov %p812_p1 }
  0x55   : > { %v582_v0 = vmov 0.0|0.0   ;;  %vm583_vm0 = vmmov 0   ;;  %v584_v1 = vmov 0.0   ;;  %v175_v2 = vld [vmem:[#allocation5] sm:$0xff]  ;;  %v176_v3 = vld [vmem:[#allocation5 + $0x8] sm:$0xff]  ;;  %v177_v4 = vld [vmem:[#allocation5 + $0x10] sm:$0xff] }
  0x56   : > { %557 = vsyncadd (%p813_p11), [#allocation6], 4294966784  ;;  %380 = vmatprep.subr.bf16.mxu0 %v582_v0  ;;  %377 = vmatprep.mubr.msk.f32.mxu0 %vm583_vm0, %v584_v1  ;;  %v381_v5 = vpack.c.bf16 %v176_v3, %v175_v2  ;;  %v178_v6 = vld [vmem:[#allocation5 + $0x18] sm:$0xff]  ;;  %vm179_vm1 = vcmask 261120   ;;  %s361_s15 = sshll.u32 %s622_s13, 7  ;;  %s173_s17 = scalar_lea.vmem [#allocation7], %s356_s26 }
  0x57   : > { %v384_v7 = vpack.c.bf16 %v178_v6, %v177_v4  ;;  %v174_v8 = vld [vmem:[%s149_s29] sm:$0xff]  ;;  %s269_s27 = sshll.u32 %s173_s17, 4  ;;  %vm253_vm2 = vcmask 785408   ;;  %s753_s28 = scalar_lea.hbm %s799_s2, %s361_s15  ;;  %s755_s27 = int_to_ptr.vmem [resolvable:$true] %s269_s27 }
  0x58   : > { %382 = vmatpush3.bf16.msra.mxu0 %v381_v5  ;;  %s256_s30 = scalar_lea.sflag [#allocation4], %s737_s20  ;;  %s506_s3 = scalar_lea.vmem %s755_s27, 128 }
  0x59   : > { %383 = vmatprep.subr.bf16.mxu0 %v582_v0  ;;  %p507_p4 = scmp.ne.s32.totalorder %s755_s27, %s506_s3  ;;  %s585_s13 = smov [#allocation7]  }
  0x5a   : > { %s510_s4 = sshll.u32 %s585_s13, 4  ;;  %s511_s4 = int_to_ptr.vmem [resolvable:$false] %s510_s4 }
  0x5b   : > { %p508_p6 = pnand %p507_p4, %p692_p12  ;;  %s512_s5 = scalar_lea.vmem %s511_s4, 256 }
  0x5c   : > { %385 = vmatpush3.bf16.msra.mxu0 %v384_v7  ;;  %p513_p10 = scmp.lt.s32.totalorder %s755_s27, %s511_s4  ;;  %p514_p13 = scmp.lt.s32.totalorder %s512_s5, %s506_s3 }
  0x5d   : > { %p509_p8 = pneg %p508_p6 }
  0x5e   : > { %p515_p3 = por %p514_p13, %p513_p10 }
  0x5f   : > { %378 = vmatmul.mubr.msk.f32.vlgmr.msra.gmra.mrb[0].mxu0 %vm179_vm1, %v174_v8 }
  0x60   : > { %p516_p7 = pnand %p515_p3, %p509_p8 }
 0x132   : > { %v249_v9 = vpop.f32.mrb[0].mxu0 }
 0x133   : > { %254 = vst.msk [vmem:[%s173_s17] sm:$0xff] %vm253_vm2, %v249_v9  ;;  %v379_v10 = vpop.f32.mrb[1].mxu0 }
 0x134   : > { %519 = shalt.err (!%p516_p7)
}
 0x135   : > { %s520_s6 = scalar_lea.hbm %s753_s28, 128  ;;  %s524_s24 = scalar_lea.hbm %s799_s2, 256 }
 0x136   : > { %p521_p9 = scmp.ne.s32.totalorder %s753_s28, %s520_s6  ;;  %p525_p0 = scmp.lt.u32.totalorder %s753_s28, %s799_s2 }
 0x137   : > { %p526_p1 = scmp.lt.u32.totalorder %s524_s24, %s520_s6  ;;  %p528_p4 = scmp.lt.u32.totalorder %s520_s6, %s753_s28 }
 0x138   : > { %p522_p2 = pnand %p521_p9, %p692_p12 }
 0x139   : > { %p527_p11 = por %p526_p1, %p525_p0 }
 0x13a   : > { %p523_p5 = pneg %p522_p2 }
 0x13b   : > { %p529_p6 = por %p528_p4, %p527_p11 }
 0x13d   : > { %p530_p8 = pnand %p529_p6, %p523_p5 }
 0x13f   : > { %533 = shalt.err (!%p530_p8)
}
 0x140   : > { %392 = dma.vmem_to_hbm [thread:$0]  (%p692_p12), %s755_s27, 128, %s753_s28, %s256_s30  }
 0x141 PF: > { %s281_s26 = sand.u32 1, %s564_s9   ;;  %p814_p10 = scmp.ne.s32.totalorder %s804_s16, 0 }
 0x142   : > { %p815_p13 = scmp.ge.s32.totalorder %s576_s12, 2  ;;  %s282_s19 = scalar_lea.sflag [#allocation4], %s281_s26 }
 0x144   : > { %p403_p3 = pnand %p815_p13, %p814_p10 }
 0x146   : > { %559 = dma.done.wait (!%p403_p3), %s282_s19, 128  }
 0x147   : > { %561 = vsyncadd (!%p403_p3), %s282_s19, 4294967168  ;;  %p16_p7 = scmp.ge.s32.totalorder %s657_s21, 4   ;;  %s816_s9 = smov %s568_s10 }
 0x148   : > { %s817_s10 = smov %s572_s11  ;;  %s818_s11 = smov %s688_s8 }
 0x149   : > { %s819_s12 = smov %s657_s21  ;;  %18 = sbr.rel (!%p16_p7) target bundleno = 6 (0x6), region = 77 }
 0x150   :  { %287 = vsyncpa [#allocation3], 1 }
 0x151   :  { %289 = vsyncpa [#allocation3 + $0x1], 1 }
 0x152   :  { %290 = vsyncpa [#allocation6], 1 }
 0x153   :  { %291 = vsyncpa [#allocation4], 1 }
 0x154   :  { %293 = vsyncpa [#allocation4 + $0x1], 1 }

</bundles_post_ra>
